<compile_context>
chip_gen: v7x
topology: tpu7x:2x2x1
jax: 0.10.0
libtpu: 0.0.40
codegen_flags: <defaults>
</compile_context>

<pallas_src>
import jax
import jax.numpy as jnp
from jax import lax
from jax.experimental import pallas as pl
from jax.experimental.pallas import tpu as pltpu

EPS = 1e-8

# ~2 MiB per input block => 2 arrays x 2 buffers x 2 MiB = 8 MiB VMEM footprint.
TARGET_BLOCK_BYTES = 2 << 20


def pixelnorm_kernel(x_ref, o_ref):
    # Channel axis is axis=1 of the block in both layouts used below.
    x = x_ref[...].astype(jnp.float32)
    ms = jnp.mean(x * x, axis=1, keepdims=True)
    o_ref[...] = (x * lax.rsqrt(ms + EPS)).astype(o_ref.dtype)


def _plan_packed(B, C, S, itemsize, target):
    """Tile plan for the (B, C, S, 128) layout; block = (Bt, C, ts, 128)."""
    per_s = C * 128 * itemsize                      # bytes per sublane-row of spatial
    max_ts = max(1, target // per_s)
    if S <= max_ts:
        ts = S                                       # full spatial in one block
        block = C * S * 128 * itemsize
        Bt = int(min(B, max(1, target // max(block, 1))))
        while B % Bt:                                # keep batch blocks uniform
            Bt -= 1
    else:
        ts = int(min(S, max(8, (max_ts // 8) * 8)))  # sublane-aligned, cdiv grid
        Bt = 1
    return Bt, ts


def _plan_flat(B, C, HW, itemsize, target):
    """Tile plan for the (B, C, HW) layout; block = (Bt, C, t)."""
    per_sp = C * itemsize
    max_t = max(1, target // per_sp)
    if HW <= max_t:
        t = HW                                       # full extent (always legal)
        block = C * HW * itemsize
        Bt = int(min(B, max(1, target // max(block, 1))))
        while B % Bt:
            Bt -= 1
    else:
        t = int(max(128, (max_t // 128) * 128))      # lane-aligned, cdiv grid
        Bt = 1
    return Bt, t


def pixel_norm(x, *, target_block_bytes=TARGET_BLOCK_BYTES):
    """PixelNorm over dim=1 for any input of rank >= 2 (e.g. NCHW or NC)."""
    assert x.ndim >= 2, "PixelNorm expects at least (B, C)"
    orig_shape = x.shape
    B, C = x.shape[0], x.shape[1]
    HW = 1
    for d in x.shape[2:]:
        HW *= d
    itemsize = jnp.dtype(x.dtype).itemsize

    if HW >= 128 and HW % 128 == 0:
        # Preferred layout: spatial on both sublanes and lanes.
        S = HW // 128
        xr = x.reshape(B, C, S, 128)
        Bt, ts = _plan_packed(B, C, S, itemsize, target_block_bytes)
        grid = (pl.cdiv(B, Bt), pl.cdiv(S, ts))
        out = pl.pallas_call(
            pixelnorm_kernel,
            out_shape=jax.ShapeDtypeStruct((B, C, S, 128), x.dtype),
            grid=grid,
            in_specs=[pl.BlockSpec((Bt, C, ts, 128), lambda b, j: (b, 0, j, 0))],
            out_specs=pl.BlockSpec((Bt, C, ts, 128), lambda b, j: (b, 0, j, 0)),
            compiler_params=pltpu.CompilerParams(
                dimension_semantics=("parallel", "parallel")),
        )(xr)
    else:
        # Fallback: channels on sublanes, cdiv tiling along flattened spatial.
        xr = x.reshape(B, C, HW)
        Bt, t = _plan_flat(B, C, HW, itemsize, target_block_bytes)
        grid = (pl.cdiv(B, Bt), pl.cdiv(HW, t))
        out = pl.pallas_call(
            pixelnorm_kernel,
            out_shape=jax.ShapeDtypeStruct((B, C, HW), x.dtype),
            grid=grid,
            in_specs=[pl.BlockSpec((Bt, C, t), lambda b, j: (b, 0, j))],
            out_specs=pl.BlockSpec((Bt, C, t), lambda b, j: (b, 0, j)),
            compiler_params=pltpu.CompilerParams(
                dimension_semantics=("parallel", "parallel")),
        )(xr)
    return out.reshape(orig_shape)


def pixel_norm_reference(x):
    # Pure-jnp mirror of the PyTorch forward.
    xf = x.astype(jnp.float32)
    ms = jnp.mean(jnp.square(xf), axis=1, keepdims=True)
    return (xf * lax.rsqrt(ms + EPS)).astype(x.dtype)


def _check(x, **kw):
    fn = jax.jit(pixel_norm, static_argnames=("target_block_bytes",))
    out = jax.block_until_ready(fn(x, **kw))
    ref = pixel_norm_reference(x)
    assert out.shape == x.shape
    max_err = float(jnp.max(jnp.abs(out - ref)))
    assert max_err < 1e-5, f"kernel/reference mismatch: {max_err}"


if __name__ == "__main__":
    key = jax.random.PRNGKey(0)
    k1, k2, k3 = jax.random.split(key, 3)

    # 1) Canonical small NCHW case (packed (B,C,S,128) layout, single block).
    x1 = jax.random.normal(k1, (2, 4, 16, 16), jnp.float32)
    _check(x1)

    # 2) Multi-tile + ragged last spatial block on the packed path
    #    (tiny block target forces grid (2, 3) with a partial sublane block).
    x2 = jax.random.normal(k2, (2, 4, 48, 48), jnp.float32)
    _check(x2, target_block_bytes=8192)

    # 3) Non-lane-aligned spatial extent -> flat fallback with cdiv tiling
    #    (grid (2, 4), ragged last lane block).
    x3 = jax.random.normal(k3, (2, 4, 30, 30), jnp.float32)
    _check(x3, target_block_bytes=4096)

    print("KERNEL_OK")
</pallas_src>

<mosaic_0001>
module attributes {stable_mosaic.version = 11 : i64} {
  func.func @pixelnorm_kernel(%arg0: i32, %arg1: i32, %arg2: memref<2x4x2x128xf32, #tpu.memory_space<vmem>>, %arg3: memref<2x4x2x128xf32, #tpu.memory_space<vmem>>) attributes {dimension_semantics = [#tpu.dimension_semantics<parallel>, #tpu.dimension_semantics<parallel>], iteration_bounds = array<i64: 1, 1>, scalar_prefetch = 0 : i64, scratch_operands = 0 : i64, tpu.core_type = #tpu.core_type<tc>, window_params = [{transform_indices = @transform_0, window_bounds = array<i64: 2, 4, 2, 128>}, {transform_indices = @transform_1, window_bounds = array<i64: 2, 4, 2, 128>}]} {
    %c0 = arith.constant 0 : index
    %c0_0 = arith.constant 0 : index
    %c0_1 = arith.constant 0 : index
    %c0_2 = arith.constant 0 : index
    %0 = vector.load %arg2[%c0, %c0_0, %c0_1, %c0_2] : memref<2x4x2x128xf32, #tpu.memory_space<vmem>>, vector<2x4x2x128xf32>
    %1 = arith.mulf %0, %0 : vector<2x4x2x128xf32>
    %cst = arith.constant dense<0.000000e+00> : vector<2x2x128xf32>
    %2 = vector.multi_reduction <add>, %1, %cst [1] : vector<2x4x2x128xf32> to vector<2x2x128xf32>
    %3 = vector.shape_cast %2 : vector<2x2x128xf32> to vector<2x1x2x128xf32>
    %cst_3 = arith.constant 4.000000e+00 : f32
    %4 = vector.broadcast %cst_3 : f32 to vector<2x1x2x128xf32>
    %5 = arith.divf %3, %4 : vector<2x1x2x128xf32>
    %cst_4 = arith.constant 9.99999993E-9 : f32
    %6 = vector.broadcast %cst_4 : f32 to vector<2x1x2x128xf32>
    %7 = arith.addf %5, %6 : vector<2x1x2x128xf32>
    %8 = math.rsqrt %7 : vector<2x1x2x128xf32>
    %9 = vector.broadcast %8 : vector<2x1x2x128xf32> to vector<2x4x2x128xf32>
    %10 = arith.mulf %0, %9 : vector<2x4x2x128xf32>
    %c0_5 = arith.constant 0 : index
    %c0_6 = arith.constant 0 : index
    %c0_7 = arith.constant 0 : index
    %c0_8 = arith.constant 0 : index
    %11 = vector.load %arg3[%c0_5, %c0_6, %c0_7, %c0_8] : memref<2x4x2x128xf32, #tpu.memory_space<vmem>>, vector<2x4x2x128xf32>
    tpu.vector_store %arg3[%c0_5, %c0_6, %c0_7, %c0_8], %10 {strides = array<i32>} : memref<2x4x2x128xf32, #tpu.memory_space<vmem>>, vector<2x4x2x128xf32>,
    return
  }
  func.func @transform_0(%arg0: i32, %arg1: i32) -> (i32, i32, i32, i32) {
    %c0_i32 = arith.constant 0 : i32
    %c0_i32_0 = arith.constant 0 : i32
    %c0_i32_1 = arith.constant 0 : i32
    return %arg0, %c0_i32, %arg1, %c0_i32_0 : i32, i32, i32, i32
  }
  func.func @transform_1(%arg0: i32, %arg1: i32) -> (i32, i32, i32, i32) {
    %c0_i32 = arith.constant 0 : i32
    %c0_i32_0 = arith.constant 0 : i32
    %c0_i32_1 = arith.constant 0 : i32
    return %arg0, %c0_i32, %arg1, %c0_i32_0 : i32, i32, i32, i32
  }
}

</mosaic_0001>

<bundles_post_ra>
// kernel: pixel_norm.1
= control target key start
LH: loop header
LB: loop body
LE: loop exit
PB: predicated region body
PF: predicated region fallthrough
CT: control target
= control target key end

     0   :  { %vm24_vm0 = vcmask 1041408   ;;  %s136_s0 = inlined_call_operand.vmem [shape: f32[2,4,2,128], index: 0, kind: input, shape index: {}]   ;;  %s137_s1 = inlined_call_operand.vmem [shape: f32[2,4,2,128], index: 1, kind: output, shape index: {}]  }
   0x1   :  { %v8_v0 = vld [vmem:[%s136_s0] sm:$0x3]  ;;  %v9_v1 = vld [vmem:[%s136_s0 + $0x2] sm:$0x3]  ;;  %v10_v2 = vld [vmem:[%s136_s0 + $0x4] sm:$0x3] }
   0x2   :  { %v11_v3 = vld [vmem:[%s136_s0 + $0x6] sm:$0x3]  ;;  %v16_v4 = vmul.f32 %v8_v0, %v8_v0  ;;  %v17_v5 = vmul.f32 %v9_v1, %v9_v1  ;;  %v18_v6 = vmul.f32 %v10_v2, %v10_v2  ;;  %v12_v7 = vld [vmem:[%s136_s0 + $0x8] sm:$0x3]  ;;  %v13_v8 = vld [vmem:[%s136_s0 + $0xa] sm:$0x3] }
   0x3   :  { %v19_v9 = vmul.f32 %v11_v3, %v11_v3  ;;  %v14_v10 = vld [vmem:[%s136_s0 + $0xc] sm:$0x3]  ;;  %v15_v11 = vld [vmem:[%s136_s0 + $0xe] sm:$0x3]  ;;  %v20_v12 = vmul.f32 %v12_v7, %v12_v7  ;;  %v21_v13 = vmul.f32 %v13_v8, %v13_v8 }
   0x4   :  { %v25_v14 = vsel %vm24_vm0, %v16_v4, 0.0  ;;  %v26_v15 = vsel %vm24_vm0, %v17_v5, 0.0  ;;  %v28_v16 = vsel %vm24_vm0, %v18_v6, 0.0  ;;  %v22_v17 = vmul.f32 %v14_v10, %v14_v10 }
   0x5   :  { %v27_v18 = vadd.f32 %v26_v15, %v25_v14  ;;  %v23_v19 = vmul.f32 %v15_v11, %v15_v11  ;;  %v32_v20 = vsel %vm24_vm0, %v20_v12, 0.0  ;;  %v30_v21 = vsel %vm24_vm0, %v19_v9, 0.0 }
   0x6   :  { %v33_v22 = vsel %vm24_vm0, %v21_v13, 0.0  ;;  %v35_v23 = vsel %vm24_vm0, %v22_v17, 0.0 }
   0x7   :  { %v29_v24 = vadd.f32 %v28_v16, %v27_v18  ;;  %v34_v25 = vadd.f32 %v33_v22, %v32_v20  ;;  %v37_v26 = vsel %vm24_vm0, %v23_v19, 0.0 }
   0x9   :  { %v31_v27 = vadd.f32 %v30_v21, %v29_v24  ;;  %v36_v28 = vadd.f32 %v35_v23, %v34_v25 }
   0xb   :  { %v40_v29 = vmul.f32 0.25, %v31_v27  ;;  %v38_v30 = vadd.f32 %v37_v26, %v36_v28 }
   0xd   :  { %v42_v31 = vadd.f32 1e-08, %v40_v29  ;;  %v41_v32 = vmul.f32 0.25, %v38_v30 }
   0xf   :  { %66 = vrsqrt.f32 %v42_v31  ;;  %v43_v33 = vadd.f32 1e-08, %v41_v32 }
  0x11   :  { %68 = vrsqrt.f32 %v43_v33 }
  0x19   :  { %v67_v34 = vpop.eup %66 }
  0x1a   :  { %v46_v35 = vmul.f32 %v67_v34, %v8_v0  ;;  %v47_v36 = vmul.f32 %v67_v34, %v9_v1  ;;  %v48_v37 = vmul.f32 %v67_v34, %v10_v2  ;;  %v49_v38 = vmul.f32 %v67_v34, %v11_v3 }
  0x1b   :  { %v69_v39 = vpop.eup %68 }
  0x1c   :  { %54 = vst [vmem:[%s137_s1] sm:$0x3] %v46_v35  ;;  %55 = vst [vmem:[%s137_s1 + $0x2] sm:$0x3] %v47_v36  ;;  %v50_v40 = vmul.f32 %v69_v39, %v12_v7  ;;  %v51_v41 = vmul.f32 %v69_v39, %v13_v8  ;;  %v52_v42 = vmul.f32 %v69_v39, %v14_v10 }
  0x1d   :  { %56 = vst [vmem:[%s137_s1 + $0x4] sm:$0x3] %v48_v37  ;;  %57 = vst [vmem:[%s137_s1 + $0x6] sm:$0x3] %v49_v38  ;;  %v53_v43 = vmul.f32 %v69_v39, %v15_v11 }
  0x1e   :  { %58 = vst [vmem:[%s137_s1 + $0x8] sm:$0x3] %v50_v40  ;;  %59 = vst [vmem:[%s137_s1 + $0xa] sm:$0x3] %v51_v41 }
  0x1f   :  { %60 = vst [vmem:[%s137_s1 + $0xc] sm:$0x3] %v52_v42  ;;  %61 = vst [vmem:[%s137_s1 + $0xe] sm:$0x3] %v53_v43 }

</bundles_post_ra>
